<compile_context>
chip_gen: v6e
topology: v6e:2x2x1
jax: 0.10.0
libtpu: 0.0.40
codegen_flags: <defaults>
</compile_context>

<pallas_src>
from functools import partial

import jax
import jax.numpy as jnp
from jax.experimental import pallas as pl
from jax.experimental.pallas import tpu as pltpu


def _enc_dec_kernel(imgs_ref, encb_ref, wimg_ref, wdec_ref, bdec_ref,
                    fts_ref, imgsw_ref, *, a_coef, b_coef, batch, chans):
    """Fused encode -> blend -> decode, batch*channel packed on sublanes.

    imgs_ref : (B*C, HW)  VMEM  image, NCHW flattened (row = b*C + c, HW lanes)
    encb_ref : (B*C,)     SMEM  folded encoder bias  (msgs @ w_msg + b_enc)
    wimg_ref : (C*C,)     SMEM  encoder 1x1-conv weight, flat [c_in*C + c_out]
    wdec_ref : (C, NB)    VMEM  decoder weight with redundancy-sum folded in
    bdec_ref : (1, NB)    VMEM  decoder bias with redundancy-sum folded in
    fts_ref  : (B, NB)    VMEM  output decoded bits
    imgsw_ref: (B*C, HW)  VMEM  output watermarked image
    """
    B, C = batch, chans
    _, HW = imgs_ref.shape
    inv_hw = 1.0 / HW

    x = imgs_ref[...]                      # (B*C, HW) single full unmasked load
    w_dec = wdec_ref[...]                  # (C, NB)   tiny, loaded once
    b_dec = bdec_ref[...]                  # (1, NB)

    out_rows = []                          # blended imgs_w rows, order b*C + d
    ft_rows = []                           # decoded bits rows, order b
    for b in range(B):                     # static unroll, B small
        ftb = b_dec                        # (1, NB)
        for d in range(C):                 # output channel, static unroll
            # --- encoder 1x1 conv: scalar-weight VPU FMAs, scalar bias init ---
            acc = (x[b * C + 0:b * C + 1, :] * wimg_ref[0 * C + d]
                   + encb_ref[b * C + d])                       # (1, HW)
            for c in range(1, C):
                acc = acc + x[b * C + c:b * C + c + 1, :] * wimg_ref[c * C + d]
            # --- watermark blend with precomputed coefficients ---
            row_w = (a_coef * x[b * C + d:b * C + d + 1, :]
                     + b_coef * jnp.tanh(acc))                  # (1, HW)
            out_rows.append(row_w)
            # --- decoder: mean pool (lane reduce) + folded linear head ---
            pooled = jnp.sum(row_w, axis=-1, keepdims=True) * inv_hw   # (1, 1)
            ftb = ftb + pooled * w_dec[d:d + 1, :]                      # (1, NB)
        ft_rows.append(ftb)

    imgsw_ref[...] = jnp.concatenate(out_rows, axis=0)   # (B*C, HW) full store
    # NOTE: fts is lane-width 8 -> masked store; negligible at these sizes.
    fts_ref[...] = jnp.concatenate(ft_rows, axis=0)      # (B, NB)


def encoder_decoder_forward(imgs_nchw, msgs, params, *,
                            scaling_i, scaling_w, num_bits, redundancy):
    B, C, H, W = imgs_nchw.shape
    HW = H * W
    nbr = num_bits * redundancy

    # Pack (B, C) onto the sublane axis: free reshape for NCHW-contiguous data.
    imgs = imgs_nchw.reshape(B * C, HW).astype(jnp.float32)
    msgs = msgs.astype(jnp.float32)

    # Fold message projection + encoder bias into a per-(batch, channel) scalar
    # bias, flat 1-D for SMEM (avoids 2-D SMEM padding).
    enc_bias = (msgs @ params["w_msg"] + params["b_enc"]).reshape(B * C)

    # 1x1-conv weights flat [c_in * C + c_out] for scalar SMEM reads.
    w_img_flat = params["w_img"].reshape(C * C)

    # Fold view(-1, nb, r).sum(-1) (0/1 matrix) and bias into decoder weights.
    red = (jnp.arange(nbr)[:, None] // redundancy
           == jnp.arange(num_bits)[None, :]).astype(jnp.float32)
    w_dec_f = params["w_dec"] @ red                  # (C, num_bits)
    b_dec_f = params["b_dec"] @ red                  # (1, num_bits)

    denom = float(scaling_i) + float(scaling_w)
    kernel = partial(_enc_dec_kernel,
                     a_coef=float(scaling_i) / denom,
                     b_coef=float(scaling_w) / denom,
                     batch=B, chans=C)

    vmem = pl.BlockSpec(memory_space=pltpu.MemorySpace.VMEM)
    smem = pl.BlockSpec(memory_space=pltpu.MemorySpace.SMEM)
    fts, imgs_w = pl.pallas_call(
        kernel,
        out_shape=(jax.ShapeDtypeStruct((B, num_bits), jnp.float32),
                   jax.ShapeDtypeStruct((B * C, HW), jnp.float32)),
        in_specs=[vmem, smem, smem, vmem, vmem],
        out_specs=(vmem, vmem),
    )(imgs, enc_bias, w_img_flat, w_dec_f, b_dec_f)

    imgs_w_nchw = imgs_w.reshape(B, C, H, W)        # free reshape, already NCHW
    # TODO(synk): img2img (AutoPipelineForImage2Image diffusion pipeline) has no
    # Pallas equivalent; imgs_w is returned as the stand-in for imgs_w_generation.
    imgs_w_generation = imgs_w_nchw
    return fts, (imgs_w_nchw, imgs_w_generation)


def _reference(imgs_nchw, msgs, params, *, scaling_i, scaling_w,
               num_bits, redundancy):
    """Pure-JAX reference of the same forward, for a correctness check."""
    B, C, H, W = imgs_nchw.shape
    x = imgs_nchw.reshape(B, C, H * W).astype(jnp.float32)
    msg_proj = msgs @ params["w_msg"] + params["b_enc"]          # (B, C)
    delta = jnp.tanh(jnp.einsum("bcp,cd->bdp", x, params["w_img"])
                     + msg_proj[:, :, None])
    imgs_w = (scaling_i * x + scaling_w * delta) / (scaling_i + scaling_w)
    pooled = jnp.mean(imgs_w, axis=2)                            # (B, C)
    fts_raw = pooled @ params["w_dec"] + params["b_dec"][0]
    fts = jnp.sum(fts_raw.reshape(B, num_bits, redundancy), axis=-1)
    return fts, imgs_w.reshape(B, C, H, W)


if __name__ == "__main__":
    B, C, H, W = 2, 4, 16, 16
    num_bits, redundancy = 8, 2
    L = num_bits
    scaling_i, scaling_w = 1.0, 0.3

    key = jax.random.PRNGKey(0)
    k_img, k_msg, k1, k2, k3, k4, k5 = jax.random.split(key, 7)

    imgs = jax.random.normal(k_img, (B, C, H, W), dtype=jnp.float32)
    msgs = jnp.where(jax.random.bernoulli(k_msg, 0.5, (B, L)), 1.0, -1.0)
    msgs = msgs.astype(jnp.float32)

    params = {
        "w_img": 0.1 * jax.random.normal(k1, (C, C), dtype=jnp.float32),
        "w_msg": 0.1 * jax.random.normal(k2, (L, C), dtype=jnp.float32),
        "b_enc": 0.1 * jax.random.normal(k3, (1, C), dtype=jnp.float32),
        "w_dec": 0.1 * jax.random.normal(
            k4, (C, num_bits * redundancy), dtype=jnp.float32),
        "b_dec": 0.1 * jax.random.normal(
            k5, (1, num_bits * redundancy), dtype=jnp.float32),
    }

    fts, (imgs_w, imgs_w_gen) = encoder_decoder_forward(
        imgs, msgs, params,
        scaling_i=scaling_i, scaling_w=scaling_w,
        num_bits=num_bits, redundancy=redundancy)
    jax.block_until_ready((fts, imgs_w, imgs_w_gen))

    fts_ref, imgs_w_ref = _reference(
        imgs, msgs, params,
        scaling_i=scaling_i, scaling_w=scaling_w,
        num_bits=num_bits, redundancy=redundancy)

    assert fts.shape == (B, num_bits)
    assert imgs_w.shape == (B, C, H, W)
    assert imgs_w_gen.shape == (B, C, H, W)
    assert jnp.allclose(fts, fts_ref, atol=1e-4, rtol=1e-4)
    assert jnp.allclose(imgs_w, imgs_w_ref, atol=1e-4, rtol=1e-4)

    print("KERNEL_OK")
</pallas_src>

<mosaic_0001>
module attributes {stable_mosaic.version = 11 : i64} {
  func.func @_enc_dec_kernel(%arg0: memref<8x256xf32, #tpu.memory_space<vmem>>, %arg1: memref<8xf32, #tpu.memory_space<smem>>, %arg2: memref<16xf32, #tpu.memory_space<smem>>, %arg3: memref<4x8xf32, #tpu.memory_space<vmem>>, %arg4: memref<1x8xf32, #tpu.memory_space<vmem>>, %arg5: memref<2x8xf32, #tpu.memory_space<vmem>>, %arg6: memref<8x256xf32, #tpu.memory_space<vmem>>) attributes {dimension_semantics = [], scalar_prefetch = 0 : i64, scratch_operands = 0 : i64, tpu.core_type = #tpu.core_type<tc>} {
    %c0 = arith.constant 0 : index
    %c0_0 = arith.constant 0 : index
    %0 = vector.load %arg0[%c0, %c0_0] : memref<8x256xf32, #tpu.memory_space<vmem>>, vector<8x256xf32>
    %c0_1 = arith.constant 0 : index
    %c0_2 = arith.constant 0 : index
    %1 = vector.load %arg3[%c0_1, %c0_2] : memref<4x8xf32, #tpu.memory_space<vmem>>, vector<4x8xf32>
    %c0_3 = arith.constant 0 : index
    %c0_4 = arith.constant 0 : index
    %2 = vector.load %arg4[%c0_3, %c0_4] : memref<1x8xf32, #tpu.memory_space<vmem>>, vector<1x8xf32>
    %3 = vector.extract_strided_slice %0 {offsets = [0, 0], sizes = [1, 256], strides = [1, 1]} : vector<8x256xf32> to vector<1x256xf32>
    %c0_5 = arith.constant 0 : index
    %4 = memref.load %arg2[%c0_5] : memref<16xf32, #tpu.memory_space<smem>>
    %5 = vector.broadcast %4 : f32 to vector<1x256xf32>
    %6 = arith.mulf %3, %5 : vector<1x256xf32>
    %c0_6 = arith.constant 0 : index
    %7 = memref.load %arg1[%c0_6] : memref<8xf32, #tpu.memory_space<smem>>
    %8 = vector.broadcast %7 : f32 to vector<1x256xf32>
    %9 = arith.addf %6, %8 : vector<1x256xf32>
    %10 = vector.extract_strided_slice %0 {offsets = [1, 0], sizes = [1, 256], strides = [1, 1]} : vector<8x256xf32> to vector<1x256xf32>
    %c4 = arith.constant 4 : index
    %11 = memref.load %arg2[%c4] : memref<16xf32, #tpu.memory_space<smem>>
    %12 = vector.broadcast %11 : f32 to vector<1x256xf32>
    %13 = arith.mulf %10, %12 : vector<1x256xf32>
    %14 = arith.addf %9, %13 : vector<1x256xf32>
    %15 = vector.extract_strided_slice %0 {offsets = [2, 0], sizes = [1, 256], strides = [1, 1]} : vector<8x256xf32> to vector<1x256xf32>
    %c8 = arith.constant 8 : index
    %16 = memref.load %arg2[%c8] : memref<16xf32, #tpu.memory_space<smem>>
    %17 = vector.broadcast %16 : f32 to vector<1x256xf32>
    %18 = arith.mulf %15, %17 : vector<1x256xf32>
    %19 = arith.addf %14, %18 : vector<1x256xf32>
    %20 = vector.extract_strided_slice %0 {offsets = [3, 0], sizes = [1, 256], strides = [1, 1]} : vector<8x256xf32> to vector<1x256xf32>
    %c12 = arith.constant 12 : index
    %21 = memref.load %arg2[%c12] : memref<16xf32, #tpu.memory_space<smem>>
    %22 = vector.broadcast %21 : f32 to vector<1x256xf32>
    %23 = arith.mulf %20, %22 : vector<1x256xf32>
    %24 = arith.addf %19, %23 : vector<1x256xf32>
    %25 = vector.extract_strided_slice %0 {offsets = [0, 0], sizes = [1, 256], strides = [1, 1]} : vector<8x256xf32> to vector<1x256xf32>
    %cst = arith.constant 0.769230782 : f32
    %26 = vector.broadcast %cst : f32 to vector<1x256xf32>
    %27 = arith.mulf %26, %25 : vector<1x256xf32>
    %28 = math.tanh %24 : vector<1x256xf32>
    %cst_7 = arith.constant 0.230769232 : f32
    %29 = vector.broadcast %cst_7 : f32 to vector<1x256xf32>
    %30 = arith.mulf %29, %28 : vector<1x256xf32>
    %31 = arith.addf %27, %30 : vector<1x256xf32>
    %cst_8 = arith.constant dense<0.000000e+00> : vector<1xf32>
    %32 = vector.multi_reduction <add>, %31, %cst_8 [1] : vector<1x256xf32> to vector<1xf32>
    %33 = vector.shape_cast %32 : vector<1xf32> to vector<1x1xf32>
    %cst_9 = arith.constant 3.906250e-03 : f32
    %34 = vector.broadcast %cst_9 : f32 to vector<1x1xf32>
    %35 = arith.mulf %33, %34 : vector<1x1xf32>
    %36 = vector.extract_strided_slice %1 {offsets = [0, 0], sizes = [1, 8], strides = [1, 1]} : vector<4x8xf32> to vector<1x8xf32>
    %37 = vector.broadcast %35 : vector<1x1xf32> to vector<1x8xf32>
    %38 = arith.mulf %37, %36 : vector<1x8xf32>
    %39 = arith.addf %2, %38 : vector<1x8xf32>
    %40 = vector.extract_strided_slice %0 {offsets = [0, 0], sizes = [1, 256], strides = [1, 1]} : vector<8x256xf32> to vector<1x256xf32>
    %c1 = arith.constant 1 : index
    %41 = memref.load %arg2[%c1] : memref<16xf32, #tpu.memory_space<smem>>
    %42 = vector.broadcast %41 : f32 to vector<1x256xf32>
    %43 = arith.mulf %40, %42 : vector<1x256xf32>
    %c1_10 = arith.constant 1 : index
    %44 = memref.load %arg1[%c1_10] : memref<8xf32, #tpu.memory_space<smem>>
    %45 = vector.broadcast %44 : f32 to vector<1x256xf32>
    %46 = arith.addf %43, %45 : vector<1x256xf32>
    %47 = vector.extract_strided_slice %0 {offsets = [1, 0], sizes = [1, 256], strides = [1, 1]} : vector<8x256xf32> to vector<1x256xf32>
    %c5 = arith.constant 5 : index
    %48 = memref.load %arg2[%c5] : memref<16xf32, #tpu.memory_space<smem>>
    %49 = vector.broadcast %48 : f32 to vector<1x256xf32>
    %50 = arith.mulf %47, %49 : vector<1x256xf32>
    %51 = arith.addf %46, %50 : vector<1x256xf32>
    %52 = vector.extract_strided_slice %0 {offsets = [2, 0], sizes = [1, 256], strides = [1, 1]} : vector<8x256xf32> to vector<1x256xf32>
    %c9 = arith.constant 9 : index
    %53 = memref.load %arg2[%c9] : memref<16xf32, #tpu.memory_space<smem>>
    %54 = vector.broadcast %53 : f32 to vector<1x256xf32>
    %55 = arith.mulf %52, %54 : vector<1x256xf32>
    %56 = arith.addf %51, %55 : vector<1x256xf32>
    %57 = vector.extract_strided_slice %0 {offsets = [3, 0], sizes = [1, 256], strides = [1, 1]} : vector<8x256xf32> to vector<1x256xf32>
    %c13 = arith.constant 13 : index
    %58 = memref.load %arg2[%c13] : memref<16xf32, #tpu.memory_space<smem>>
    %59 = vector.broadcast %58 : f32 to vector<1x256xf32>
    %60 = arith.mulf %57, %59 : vector<1x256xf32>
    %61 = arith.addf %56, %60 : vector<1x256xf32>
    %62 = vector.extract_strided_slice %0 {offsets = [1, 0], sizes = [1, 256], strides = [1, 1]} : vector<8x256xf32> to vector<1x256xf32>
    %cst_11 = arith.constant 0.769230782 : f32
    %63 = vector.broadcast %cst_11 : f32 to vector<1x256xf32>
    %64 = arith.mulf %63, %62 : vector<1x256xf32>
    %65 = math.tanh %61 : vector<1x256xf32>
    %cst_12 = arith.constant 0.230769232 : f32
    %66 = vector.broadcast %cst_12 : f32 to vector<1x256xf32>
    %67 = arith.mulf %66, %65 : vector<1x256xf32>
    %68 = arith.addf %64, %67 : vector<1x256xf32>
    %cst_13 = arith.constant dense<0.000000e+00> : vector<1xf32>
    %69 = vector.multi_reduction <add>, %68, %cst_13 [1] : vector<1x256xf32> to vector<1xf32>
    %70 = vector.shape_cast %69 : vector<1xf32> to vector<1x1xf32>
    %cst_14 = arith.constant 3.906250e-03 : f32
    %71 = vector.broadcast %cst_14 : f32 to vector<1x1xf32>
    %72 = arith.mulf %70, %71 : vector<1x1xf32>
    %73 = vector.extract_strided_slice %1 {offsets = [1, 0], sizes = [1, 8], strides = [1, 1]} : vector<4x8xf32> to vector<1x8xf32>
    %74 = vector.broadcast %72 : vector<1x1xf32> to vector<1x8xf32>
    %75 = arith.mulf %74, %73 : vector<1x8xf32>
    %76 = arith.addf %39, %75 : vector<1x8xf32>
    %77 = vector.extract_strided_slice %0 {offsets = [0, 0], sizes = [1, 256], strides = [1, 1]} : vector<8x256xf32> to vector<1x256xf32>
    %c2 = arith.constant 2 : index
    %78 = memref.load %arg2[%c2] : memref<16xf32, #tpu.memory_space<smem>>
    %79 = vector.broadcast %78 : f32 to vector<1x256xf32>
    %80 = arith.mulf %77, %79 : vector<1x256xf32>
    %c2_15 = arith.constant 2 : index
    %81 = memref.load %arg1[%c2_15] : memref<8xf32, #tpu.memory_space<smem>>
    %82 = vector.broadcast %81 : f32 to vector<1x256xf32>
    %83 = arith.addf %80, %82 : vector<1x256xf32>
    %84 = vector.extract_strided_slice %0 {offsets = [1, 0], sizes = [1, 256], strides = [1, 1]} : vector<8x256xf32> to vector<1x256xf32>
    %c6 = arith.constant 6 : index
    %85 = memref.load %arg2[%c6] : memref<16xf32, #tpu.memory_space<smem>>
    %86 = vector.broadcast %85 : f32 to vector<1x256xf32>
    %87 = arith.mulf %84, %86 : vector<1x256xf32>
    %88 = arith.addf %83, %87 : vector<1x256xf32>
    %89 = vector.extract_strided_slice %0 {offsets = [2, 0], sizes = [1, 256], strides = [1, 1]} : vector<8x256xf32> to vector<1x256xf32>
    %c10 = arith.constant 10 : index
    %90 = memref.load %arg2[%c10] : memref<16xf32, #tpu.memory_space<smem>>
    %91 = vector.broadcast %90 : f32 to vector<1x256xf32>
    %92 = arith.mulf %89, %91 : vector<1x256xf32>
    %93 = arith.addf %88, %92 : vector<1x256xf32>
    %94 = vector.extract_strided_slice %0 {offsets = [3, 0], sizes = [1, 256], strides = [1, 1]} : vector<8x256xf32> to vector<1x256xf32>
    %c14 = arith.constant 14 : index
    %95 = memref.load %arg2[%c14] : memref<16xf32, #tpu.memory_space<smem>>
    %96 = vector.broadcast %95 : f32 to vector<1x256xf32>
    %97 = arith.mulf %94, %96 : vector<1x256xf32>
    %98 = arith.addf %93, %97 : vector<1x256xf32>
    %99 = vector.extract_strided_slice %0 {offsets = [2, 0], sizes = [1, 256], strides = [1, 1]} : vector<8x256xf32> to vector<1x256xf32>
    %cst_16 = arith.constant 0.769230782 : f32
    %100 = vector.broadcast %cst_16 : f32 to vector<1x256xf32>
    %101 = arith.mulf %100, %99 : vector<1x256xf32>
    %102 = math.tanh %98 : vector<1x256xf32>
    %cst_17 = arith.constant 0.230769232 : f32
    %103 = vector.broadcast %cst_17 : f32 to vector<1x256xf32>
    %104 = arith.mulf %103, %102 : vector<1x256xf32>
    %105 = arith.addf %101, %104 : vector<1x256xf32>
    %cst_18 = arith.constant dense<0.000000e+00> : vector<1xf32>
    %106 = vector.multi_reduction <add>, %105, %cst_18 [1] : vector<1x256xf32> to vector<1xf32>
    %107 = vector.shape_cast %106 : vector<1xf32> to vector<1x1xf32>
    %cst_19 = arith.constant 3.906250e-03 : f32
    %108 = vector.broadcast %cst_19 : f32 to vector<1x1xf32>
    %109 = arith.mulf %107, %108 : vector<1x1xf32>
    %110 = vector.extract_strided_slice %1 {offsets = [2, 0], sizes = [1, 8], strides = [1, 1]} : vector<4x8xf32> to vector<1x8xf32>
    %111 = vector.broadcast %109 : vector<1x1xf32> to vector<1x8xf32>
    %112 = arith.mulf %111, %110 : vector<1x8xf32>
    %113 = arith.addf %76, %112 : vector<1x8xf32>
    %114 = vector.extract_strided_slice %0 {offsets = [0, 0], sizes = [1, 256], strides = [1, 1]} : vector<8x256xf32> to vector<1x256xf32>
    %c3 = arith.constant 3 : index
    %115 = memref.load %arg2[%c3] : memref<16xf32, #tpu.memory_space<smem>>
    %116 = vector.broadcast %115 : f32 to vector<1x256xf32>
    %117 = arith.mulf %114, %116 : vector<1x256xf32>
    %c3_20 = arith.constant 3 : index
    %118 = memref.load %arg1[%c3_20] : memref<8xf32, #tpu.memory_space<smem>>
    %119 = vector.broadcast %118 : f32 to vector<1x256xf32>
    %120 = arith.addf %117, %119 : vector<1x256xf32>
    %121 = vector.extract_strided_slice %0 {offsets = [1, 0], sizes = [1, 256], strides = [1, 1]} : vector<8x256xf32> to vector<1x256xf32>
    %c7 = arith.constant 7 : index
    %122 = memref.load %arg2[%c7] : memref<16xf32, #tpu.memory_space<smem>>
    %123 = vector.broadcast %122 : f32 to vector<1x256xf32>
    %124 = arith.mulf %121, %123 : vector<1x256xf32>
    %125 = arith.addf %120, %124 : vector<1x256xf32>
    %126 = vector.extract_strided_slice %0 {offsets = [2, 0], sizes = [1, 256], strides = [1, 1]} : vector<8x256xf32> to vector<1x256xf32>
    %c11 = arith.constant 11 : index
    %127 = memref.load %arg2[%c11] : memref<16xf32, #tpu.memory_space<smem>>
    %128 = vector.broadcast %127 : f32 to vector<1x256xf32>
    %129 = arith.mulf %126, %128 : vector<1x256xf32>
    %130 = arith.addf %125, %129 : vector<1x256xf32>
    %131 = vector.extract_strided_slice %0 {offsets = [3, 0], sizes = [1, 256], strides = [1, 1]} : vector<8x256xf32> to vector<1x256xf32>
    %c15 = arith.constant 15 : index
    %132 = memref.load %arg2[%c15] : memref<16xf32, #tpu.memory_space<smem>>
    %133 = vector.broadcast %132 : f32 to vector<1x256xf32>
    %134 = arith.mulf %131, %133 : vector<1x256xf32>
    %135 = arith.addf %130, %134 : vector<1x256xf32>
    %136 = vector.extract_strided_slice %0 {offsets = [3, 0], sizes = [1, 256], strides = [1, 1]} : vector<8x256xf32> to vector<1x256xf32>
    %cst_21 = arith.constant 0.769230782 : f32
    %137 = vector.broadcast %cst_21 : f32 to vector<1x256xf32>
    %138 = arith.mulf %137, %136 : vector<1x256xf32>
    %139 = math.tanh %135 : vector<1x256xf32>
    %cst_22 = arith.constant 0.230769232 : f32
    %140 = vector.broadcast %cst_22 : f32 to vector<1x256xf32>
    %141 = arith.mulf %140, %139 : vector<1x256xf32>
    %142 = arith.addf %138, %141 : vector<1x256xf32>
    %cst_23 = arith.constant dense<0.000000e+00> : vector<1xf32>
    %143 = vector.multi_reduction <add>, %142, %cst_23 [1] : vector<1x256xf32> to vector<1xf32>
    %144 = vector.shape_cast %143 : vector<1xf32> to vector<1x1xf32>
    %cst_24 = arith.constant 3.906250e-03 : f32
    %145 = vector.broadcast %cst_24 : f32 to vector<1x1xf32>
    %146 = arith.mulf %144, %145 : vector<1x1xf32>
    %147 = vector.extract_strided_slice %1 {offsets = [3, 0], sizes = [1, 8], strides = [1, 1]} : vector<4x8xf32> to vector<1x8xf32>
    %148 = vector.broadcast %146 : vector<1x1xf32> to vector<1x8xf32>
    %149 = arith.mulf %148, %147 : vector<1x8xf32>
    %150 = arith.addf %113, %149 : vector<1x8xf32>
    %151 = vector.extract_strided_slice %0 {offsets = [4, 0], sizes = [1, 256], strides = [1, 1]} : vector<8x256xf32> to vector<1x256xf32>
    %c0_25 = arith.constant 0 : index
    %152 = memref.load %arg2[%c0_25] : memref<16xf32, #tpu.memory_space<smem>>
    %153 = vector.broadcast %152 : f32 to vector<1x256xf32>
    %154 = arith.mulf %151, %153 : vector<1x256xf32>
    %c4_26 = arith.constant 4 : index
    %155 = memref.load %arg1[%c4_26] : memref<8xf32, #tpu.memory_space<smem>>
    %156 = vector.broadcast %155 : f32 to vector<1x256xf32>
    %157 = arith.addf %154, %156 : vector<1x256xf32>
    %158 = vector.extract_strided_slice %0 {offsets = [5, 0], sizes = [1, 256], strides = [1, 1]} : vector<8x256xf32> to vector<1x256xf32>
    %c4_27 = arith.constant 4 : index
    %159 = memref.load %arg2[%c4_27] : memref<16xf32, #tpu.memory_space<smem>>
    %160 = vector.broadcast %159 : f32 to vector<1x256xf32>
    %161 = arith.mulf %158, %160 : vector<1x256xf32>
    %162 = arith.addf %157, %161 : vector<1x256xf32>
    %163 = vector.extract_strided_slice %0 {offsets = [6, 0], sizes = [1, 256], strides = [1, 1]} : vector<8x256xf32> to vector<1x256xf32>
    %c8_28 = arith.constant 8 : index
    %164 = memref.load %arg2[%c8_28] : memref<16xf32, #tpu.memory_space<smem>>
    %165 = vector.broadcast %164 : f32 to vector<1x256xf32>
    %166 = arith.mulf %163, %165 : vector<1x256xf32>
    %167 = arith.addf %162, %166 : vector<1x256xf32>
    %168 = vector.extract_strided_slice %0 {offsets = [7, 0], sizes = [1, 256], strides = [1, 1]} : vector<8x256xf32> to vector<1x256xf32>
    %c12_29 = arith.constant 12 : index
    %169 = memref.load %arg2[%c12_29] : memref<16xf32, #tpu.memory_space<smem>>
    %170 = vector.broadcast %169 : f32 to vector<1x256xf32>
    %171 = arith.mulf %168, %170 : vector<1x256xf32>
    %172 = arith.addf %167, %171 : vector<1x256xf32>
    %173 = vector.extract_strided_slice %0 {offsets = [4, 0], sizes = [1, 256], strides = [1, 1]} : vector<8x256xf32> to vector<1x256xf32>
    %cst_30 = arith.constant 0.769230782 : f32
    %174 = vector.broadcast %cst_30 : f32 to vector<1x256xf32>
    %175 = arith.mulf %174, %173 : vector<1x256xf32>
    %176 = math.tanh %172 : vector<1x256xf32>
    %cst_31 = arith.constant 0.230769232 : f32
    %177 = vector.broadcast %cst_31 : f32 to vector<1x256xf32>
    %178 = arith.mulf %177, %176 : vector<1x256xf32>
    %179 = arith.addf %175, %178 : vector<1x256xf32>
    %cst_32 = arith.constant dense<0.000000e+00> : vector<1xf32>
    %180 = vector.multi_reduction <add>, %179, %cst_32 [1] : vector<1x256xf32> to vector<1xf32>
    %181 = vector.shape_cast %180 : vector<1xf32> to vector<1x1xf32>
    %cst_33 = arith.constant 3.906250e-03 : f32
    %182 = vector.broadcast %cst_33 : f32 to vector<1x1xf32>
    %183 = arith.mulf %181, %182 : vector<1x1xf32>
    %184 = vector.extract_strided_slice %1 {offsets = [0, 0], sizes = [1, 8], strides = [1, 1]} : vector<4x8xf32> to vector<1x8xf32>
    %185 = vector.broadcast %183 : vector<1x1xf32> to vector<1x8xf32>
    %186 = arith.mulf %185, %184 : vector<1x8xf32>
    %187 = arith.addf %2, %186 : vector<1x8xf32>
    %188 = vector.extract_strided_slice %0 {offsets = [4, 0], sizes = [1, 256], strides = [1, 1]} : vector<8x256xf32> to vector<1x256xf32>
    %c1_34 = arith.constant 1 : index
    %189 = memref.load %arg2[%c1_34] : memref<16xf32, #tpu.memory_space<smem>>
    %190 = vector.broadcast %189 : f32 to vector<1x256xf32>
    %191 = arith.mulf %188, %190 : vector<1x256xf32>
    %c5_35 = arith.constant 5 : index
    %192 = memref.load %arg1[%c5_35] : memref<8xf32, #tpu.memory_space<smem>>
    %193 = vector.broadcast %192 : f32 to vector<1x256xf32>
    %194 = arith.addf %191, %193 : vector<1x256xf32>
    %195 = vector.extract_strided_slice %0 {offsets = [5, 0], sizes = [1, 256], strides = [1, 1]} : vector<8x256xf32> to vector<1x256xf32>
    %c5_36 = arith.constant 5 : index
    %196 = memref.load %arg2[%c5_36] : memref<16xf32, #tpu.memory_space<smem>>
    %197 = vector.broadcast %196 : f32 to vector<1x256xf32>
    %198 = arith.mulf %195, %197 : vector<1x256xf32>
    %199 = arith.addf %194, %198 : vector<1x256xf32>
    %200 = vector.extract_strided_slice %0 {offsets = [6, 0], sizes = [1, 256], strides = [1, 1]} : vector<8x256xf32> to vector<1x256xf32>
    %c9_37 = arith.constant 9 : index
    %201 = memref.load %arg2[%c9_37] : memref<16xf32, #tpu.memory_space<smem>>
    %202 = vector.broadcast %201 : f32 to vector<1x256xf32>
    %203 = arith.mulf %200, %202 : vector<1x256xf32>
    %204 = arith.addf %199, %203 : vector<1x256xf32>
    %205 = vector.extract_strided_slice %0 {offsets = [7, 0], sizes = [1, 256], strides = [1, 1]} : vector<8x256xf32> to vector<1x256xf32>
    %c13_38 = arith.constant 13 : index
    %206 = memref.load %arg2[%c13_38] : memref<16xf32, #tpu.memory_space<smem>>
    %207 = vector.broadcast %206 : f32 to vector<1x256xf32>
    %208 = arith.mulf %205, %207 : vector<1x256xf32>
    %209 = arith.addf %204, %208 : vector<1x256xf32>
    %210 = vector.extract_strided_slice %0 {offsets = [5, 0], sizes = [1, 256], strides = [1, 1]} : vector<8x256xf32> to vector<1x256xf32>
    %cst_39 = arith.constant 0.769230782 : f32
    %211 = vector.broadcast %cst_39 : f32 to vector<1x256xf32>
    %212 = arith.mulf %211, %210 : vector<1x256xf32>
    %213 = math.tanh %209 : vector<1x256xf32>
    %cst_40 = arith.constant 0.230769232 : f32
    %214 = vector.broadcast %cst_40 : f32 to vector<1x256xf32>
    %215 = arith.mulf %214, %213 : vector<1x256xf32>
    %216 = arith.addf %212, %215 : vector<1x256xf32>
    %cst_41 = arith.constant dense<0.000000e+00> : vector<1xf32>
    %217 = vector.multi_reduction <add>, %216, %cst_41 [1] : vector<1x256xf32> to vector<1xf32>
    %218 = vector.shape_cast %217 : vector<1xf32> to vector<1x1xf32>
    %cst_42 = arith.constant 3.906250e-03 : f32
    %219 = vector.broadcast %cst_42 : f32 to vector<1x1xf32>
    %220 = arith.mulf %218, %219 : vector<1x1xf32>
    %221 = vector.extract_strided_slice %1 {offsets = [1, 0], sizes = [1, 8], strides = [1, 1]} : vector<4x8xf32> to vector<1x8xf32>
    %222 = vector.broadcast %220 : vector<1x1xf32> to vector<1x8xf32>
    %223 = arith.mulf %222, %221 : vector<1x8xf32>
    %224 = arith.addf %187, %223 : vector<1x8xf32>
    %225 = vector.extract_strided_slice %0 {offsets = [4, 0], sizes = [1, 256], strides = [1, 1]} : vector<8x256xf32> to vector<1x256xf32>
    %c2_43 = arith.constant 2 : index
    %226 = memref.load %arg2[%c2_43] : memref<16xf32, #tpu.memory_space<smem>>
    %227 = vector.broadcast %226 : f32 to vector<1x256xf32>
    %228 = arith.mulf %225, %227 : vector<1x256xf32>
    %c6_44 = arith.constant 6 : index
    %229 = memref.load %arg1[%c6_44] : memref<8xf32, #tpu.memory_space<smem>>
    %230 = vector.broadcast %229 : f32 to vector<1x256xf32>
    %231 = arith.addf %228, %230 : vector<1x256xf32>
    %232 = vector.extract_strided_slice %0 {offsets = [5, 0], sizes = [1, 256], strides = [1, 1]} : vector<8x256xf32> to vector<1x256xf32>
    %c6_45 = arith.constant 6 : index
    %233 = memref.load %arg2[%c6_45] : memref<16xf32, #tpu.memory_space<smem>>
    %234 = vector.broadcast %233 : f32 to vector<1x256xf32>
    %235 = arith.mulf %232, %234 : vector<1x256xf32>
    %236 = arith.addf %231, %235 : vector<1x256xf32>
    %237 = vector.extract_strided_slice %0 {offsets = [6, 0], sizes = [1, 256], strides = [1, 1]} : vector<8x256xf32> to vector<1x256xf32>
    %c10_46 = arith.constant 10 : index
    %238 = memref.load %arg2[%c10_46] : memref<16xf32, #tpu.memory_space<smem>>
    %239 = vector.broadcast %238 : f32 to vector<1x256xf32>
    %240 = arith.mulf %237, %239 : vector<1x256xf32>
    %241 = arith.addf %236, %240 : vector<1x256xf32>
    %242 = vector.extract_strided_slice %0 {offsets = [7, 0], sizes = [1, 256], strides = [1, 1]} : vector<8x256xf32> to vector<1x256xf32>
    %c14_47 = arith.constant 14 : index
    %243 = memref.load %arg2[%c14_47] : memref<16xf32, #tpu.memory_space<smem>>
    %244 = vector.broadcast %243 : f32 to vector<1x256xf32>
    %245 = arith.mulf %242, %244 : vector<1x256xf32>
    %246 = arith.addf %241, %245 : vector<1x256xf32>
    %247 = vector.extract_strided_slice %0 {offsets = [6, 0], sizes = [1, 256], strides = [1, 1]} : vector<8x256xf32> to vector<1x256xf32>
    %cst_48 = arith.constant 0.769230782 : f32
    %248 = vector.broadcast %cst_48 : f32 to vector<1x256xf32>
    %249 = arith.mulf %248, %247 : vector<1x256xf32>
    %250 = math.tanh %246 : vector<1x256xf32>
    %cst_49 = arith.constant 0.230769232 : f32
    %251 = vector.broadcast %cst_49 : f32 to vector<1x256xf32>
    %252 = arith.mulf %251, %250 : vector<1x256xf32>
    %253 = arith.addf %249, %252 : vector<1x256xf32>
    %cst_50 = arith.constant dense<0.000000e+00> : vector<1xf32>
    %254 = vector.multi_reduction <add>, %253, %cst_50 [1] : vector<1x256xf32> to vector<1xf32>
    %255 = vector.shape_cast %254 : vector<1xf32> to vector<1x1xf32>
    %cst_51 = arith.constant 3.906250e-03 : f32
    %256 = vector.broadcast %cst_51 : f32 to vector<1x1xf32>
    %257 = arith.mulf %255, %256 : vector<1x1xf32>
    %258 = vector.extract_strided_slice %1 {offsets = [2, 0], sizes = [1, 8], strides = [1, 1]} : vector<4x8xf32> to vector<1x8xf32>
    %259 = vector.broadcast %257 : vector<1x1xf32> to vector<1x8xf32>
    %260 = arith.mulf %259, %258 : vector<1x8xf32>
    %261 = arith.addf %224, %260 : vector<1x8xf32>
    %262 = vector.extract_strided_slice %0 {offsets = [4, 0], sizes = [1, 256], strides = [1, 1]} : vector<8x256xf32> to vector<1x256xf32>
    %c3_52 = arith.constant 3 : index
    %263 = memref.load %arg2[%c3_52] : memref<16xf32, #tpu.memory_space<smem>>
    %264 = vector.broadcast %263 : f32 to vector<1x256xf32>
    %265 = arith.mulf %262, %264 : vector<1x256xf32>
    %c7_53 = arith.constant 7 : index
    %266 = memref.load %arg1[%c7_53] : memref<8xf32, #tpu.memory_space<smem>>
    %267 = vector.broadcast %266 : f32 to vector<1x256xf32>
    %268 = arith.addf %265, %267 : vector<1x256xf32>
    %269 = vector.extract_strided_slice %0 {offsets = [5, 0], sizes = [1, 256], strides = [1, 1]} : vector<8x256xf32> to vector<1x256xf32>
    %c7_54 = arith.constant 7 : index
    %270 = memref.load %arg2[%c7_54] : memref<16xf32, #tpu.memory_space<smem>>
    %271 = vector.broadcast %270 : f32 to vector<1x256xf32>
    %272 = arith.mulf %269, %271 : vector<1x256xf32>
    %273 = arith.addf %268, %272 : vector<1x256xf32>
    %274 = vector.extract_strided_slice %0 {offsets = [6, 0], sizes = [1, 256], strides = [1, 1]} : vector<8x256xf32> to vector<1x256xf32>
    %c11_55 = arith.constant 11 : index
    %275 = memref.load %arg2[%c11_55] : memref<16xf32, #tpu.memory_space<smem>>
    %276 = vector.broadcast %275 : f32 to vector<1x256xf32>
    %277 = arith.mulf %274, %276 : vector<1x256xf32>
    %278 = arith.addf %273, %277 : vector<1x256xf32>
    %279 = vector.extract_strided_slice %0 {offsets = [7, 0], sizes = [1, 256], strides = [1, 1]} : vector<8x256xf32> to vector<1x256xf32>
    %c15_56 = arith.constant 15 : index
    %280 = memref.load %arg2[%c15_56] : memref<16xf32, #tpu.memory_space<smem>>
    %281 = vector.broadcast %280 : f32 to vector<1x256xf32>
    %282 = arith.mulf %279, %281 : vector<1x256xf32>
    %283 = arith.addf %278, %282 : vector<1x256xf32>
    %284 = vector.extract_strided_slice %0 {offsets = [7, 0], sizes = [1, 256], strides = [1, 1]} : vector<8x256xf32> to vector<1x256xf32>
    %cst_57 = arith.constant 0.769230782 : f32
    %285 = vector.broadcast %cst_57 : f32 to vector<1x256xf32>
    %286 = arith.mulf %285, %284 : vector<1x256xf32>
    %287 = math.tanh %283 : vector<1x256xf32>
    %cst_58 = arith.constant 0.230769232 : f32
    %288 = vector.broadcast %cst_58 : f32 to vector<1x256xf32>
    %289 = arith.mulf %288, %287 : vector<1x256xf32>
    %290 = arith.addf %286, %289 : vector<1x256xf32>
    %cst_59 = arith.constant dense<0.000000e+00> : vector<1xf32>
    %291 = vector.multi_reduction <add>, %290, %cst_59 [1] : vector<1x256xf32> to vector<1xf32>
    %292 = vector.shape_cast %291 : vector<1xf32> to vector<1x1xf32>
    %cst_60 = arith.constant 3.906250e-03 : f32
    %293 = vector.broadcast %cst_60 : f32 to vector<1x1xf32>
    %294 = arith.mulf %292, %293 : vector<1x1xf32>
    %295 = vector.extract_strided_slice %1 {offsets = [3, 0], sizes = [1, 8], strides = [1, 1]} : vector<4x8xf32> to vector<1x8xf32>
    %296 = vector.broadcast %294 : vector<1x1xf32> to vector<1x8xf32>
    %297 = arith.mulf %296, %295 : vector<1x8xf32>
    %298 = arith.addf %261, %297 : vector<1x8xf32>
    %299 = tpu.concatenate %31, %68, %105, %142, %179, %216, %253, %290 in 0 : vector<1x256xf32>, vector<1x256xf32>, vector<1x256xf32>, vector<1x256xf32>, vector<1x256xf32>, vector<1x256xf32>, vector<1x256xf32>, vector<1x256xf32> -> vector<8x256xf32>
    %c0_61 = arith.constant 0 : index
    %c0_62 = arith.constant 0 : index
    %300 = vector.load %arg6[%c0_61, %c0_62] : memref<8x256xf32, #tpu.memory_space<vmem>>, vector<8x256xf32>
    tpu.vector_store %arg6[%c0_61, %c0_62], %299 {strides = array<i32>} : memref<8x256xf32, #tpu.memory_space<vmem>>, vector<8x256xf32>,
    %301 = tpu.concatenate %150, %298 in 0 : vector<1x8xf32>, vector<1x8xf32> -> vector<2x8xf32>
    %c0_63 = arith.constant 0 : index
    %c0_64 = arith.constant 0 : index
    %302 = vector.load %arg5[%c0_63, %c0_64] : memref<2x8xf32, #tpu.memory_space<vmem>>, vector<2x8xf32>
    tpu.vector_store %arg5[%c0_63, %c0_64], %301 {strides = array<i32>} : memref<2x8xf32, #tpu.memory_space<vmem>>, vector<2x8xf32>,
    return
  }
}

</mosaic_0001>

<bundles_post_ra>
// kernel: tpu_custom_call.1
= control target key start
LH: loop header
LB: loop body
LE: loop exit
PB: predicated region body
PF: predicated region fallthrough
CT: control target
= control target key end

     0   :  { %12 = vsyncpa [#allocation3], 0  ;;  %s1197_s0 = inlined_call_operand.hbm [shape: f32[8,256], index: 0, kind: input, shape index: {}]   ;;  %s1198_s1 = inlined_call_operand.vmem [shape: f32[8], index: 1, kind: input, shape index: {}]   ;;  %s1199_s2 = inlined_call_operand.hbm [shape: f32[16], index: 2, kind: input, shape index: {}]   ;;  %s1200_s3 = inlined_call_operand.vmem [shape: f32[4,8], index: 3, kind: input, shape index: {}]   ;;  %s1201_s4 = inlined_call_operand.vmem [shape: f32[1,8], index: 4, kind: input, shape index: {}]   ;;  %s1202_s5 = inlined_call_operand.hbm [shape: f32[2,8], index: 5, kind: output, shape index: {0}]   ;;  %s1203_s6 = inlined_call_operand.hbm [shape: f32[8,256], index: 6, kind: output, shape index: {1}]  }
   0x1   :  { %13 = vsyncpa [#allocation6], 0 }
   0x2   :  { %14 = vsyncpa [#allocation5], 0 }
   0x3   :  { %15 = vsyncpa [#allocation4], 0 }
   0x4   :  { %16 = vsyncpa [#allocation11], 0  ;;  %s33_s23 = sshll.u32 %s1198_s1, 4  ;;  %s776_s24 = smov [#allocation2]   ;;  %s34_s23 = int_to_ptr.vmem [resolvable:$true] %s33_s23 }
   0x5   :  { %s23_s25 = sshll.u32 %s776_s24, 4  ;;  %s24_s25 = int_to_ptr.vmem [resolvable:$true] %s23_s25 }
   0x6   :  { %s694_s26 = scalar_lea.vmem %s24_s25, 256  ;;  %p699_p1 = scmp.lt.s32.totalorder %s24_s25, %s24_s25 }
   0x7   :  { %p695_p0 = scmp.ne.s32.totalorder %s24_s25, %s694_s26  ;;  %p700_p2 = scmp.lt.s32.totalorder %s694_s26, %s694_s26 }
   0x9   :  { %p701_p3 = por %p700_p2, %p699_p1 }
   0xb   :  { %p702_p4 = pnand %p701_p3, %p695_p0 }
   0xd   :  { %705 = shalt.err (!%p702_p4)
}
   0xe   :  { %26 = dma.hbm_to_vmem [thread:$0]  %s1197_s0, 256, %s24_s25, [#allocation3]  }
   0xf   :  { %s706_s29 = scalar_lea.vmem %s34_s23, 16  ;;  %p711_p6 = scmp.lt.s32.totalorder %s34_s23, %s34_s23 }
  0x10   :  { %p707_p5 = scmp.ne.s32.totalorder %s34_s23, %s706_s29  ;;  %p712_p7 = scmp.lt.s32.totalorder %s706_s29, %s706_s29 }
  0x12   :  { %p713_p8 = por %p712_p7, %p711_p6 }
  0x14   :  { %p714_p9 = pnand %p713_p8, %p707_p5 }
  0x16   :  { %717 = shalt.err (!%p714_p9)
}
  0x17   :  { %s777_s1 = smov [#allocation7]   ;;  %s778_s30 = smov [#allocation8]  }
  0x18   :  { %36 = dma.vmem_to_smem %s34_s23, 16, %s777_s1, [#allocation6]  }
  0x19   :  { %44 = dma.hbm_to_smem %s1199_s2, 16, %s778_s30, [#allocation5]  }
  0x1a   :  { %766 = dma.done.wait [#allocation3], 256  }
  0x1b   :  { %767 = vsyncadd [#allocation3], 4294967040 }
  0x1c   :  { %768 = dma.done.wait [#allocation6], 16  }
  0x1d   :  { %769 = vsyncadd [#allocation6], 4294967280 }
  0x1e   :  { %770 = dma.done.wait [#allocation5], 16  }
  0x1f   :  { %771 = vsyncadd [#allocation5], 4294967280 }
  0x20   :  { %58 = sfence }
  0x21   :  { %s63_s0 = sld [smem:[#allocation8]]  ;;  %v826_v0 = vld [vmem:[#allocation2] sm:$0xff]  ;;  %v830_v1 = vld [vmem:[#allocation2 + $0x8] sm:$0xff]  ;;  %vm387_vm0 = vcmask 1044484   ;;  %vm487_vm1 = vcmask 1046534   ;;  %vm438_vm2 = vcmask 1045509  }
  0x22   :  { %s626_s9 = sld [smem:[#allocation8 + $0x4]]  ;;  %v840_v5 = vmul.f32 0.7692308, %v826_v0  ;;  %v862_v13 = vmul.f32 0.7692308, %v830_v1  ;;  %vm536_vm3 = vcmask 1047559  }
  0x23   :  { %s627_s10 = sld [smem:[#allocation8 + $0x8]]  ;;  %vm180_vm4 = vcmask 1041409   ;;  %vm262_vm5 = vcmask 1042434   ;;  %vm344_vm6 = vcmask 1043459   ;;  %vm115_vm7 = vcmask 1040384   ;;  %s779_s30 = smov [#allocation10]  }
  0x24   :  { %s628_s11 = sld [smem:[#allocation8 + $0xc]]  ;;  %vm566_vm8 = vcmask 1041408   ;;  %vm569_vm9 = vcmask 1042432   ;;  %vm572_vm10 = vcmask 1043456   ;;  %vm575_vm11 = vcmask 1044480   ;;  %s611_s7 = sshll.u32 %s779_s30, 4  ;;  %s612_s7 = int_to_ptr.vmem [resolvable:$true] %s611_s7 }
  0x25   :  { %s828_s12 = sld [smem:[#allocation7 + $0x4]]  ;;  %vm578_vm12 = vcmask 1045504   ;;  %vm581_vm13 = vcmask 1046528   ;;  %s726_s8 = scalar_lea.vmem %s612_s7, 256 }
  0x26   :  { %s832_s13 = sld [smem:[#allocation8 + $0x2]]  ;;  %p727_p10 = scmp.ne.s32.totalorder %s612_s7, %s726_s8 }
  0x27   :  { %v64_v2 = vstv %s63_s0  ;;  %s834_s2 = sld [smem:[#allocation8 + $0x6]]  ;;  %p731_p11 = scmp.lt.s32.totalorder %s612_s7, %s612_s7 }
  0x28   :  { %v837_v3 = vmul.f32 %v64_v2, %v826_v0  ;;  %v72_v4 = vstv %s626_s9  ;;  %s842_s14 = sld [smem:[#allocation8 + $0xa]]  ;;  %v845_v6 = vmul.f32 %v64_v2, %v830_v1  ;;  %p732_p12 = scmp.lt.s32.totalorder %s726_s8, %s726_s8 }
  0x29   :  { %v848_v7 = vmul.f32 %v72_v4, %v826_v0  ;;  %v851_v8 = vmul.f32 %v72_v4, %v830_v1  ;;  %v84_v9 = vstv %s627_s10  ;;  %s853_s15 = sld [smem:[#allocation8 + $0xe]] }
  0x2a   :  { %v856_v10 = vmul.f32 %v84_v9, %v826_v0  ;;  %v859_v11 = vmul.f32 %v84_v9, %v830_v1  ;;  %v96_v12 = vstv %s628_s11  ;;  %s864_s16 = sld [smem:[#allocation7 + $0x6]]  ;;  %p733_p13 = por %p732_p12, %p731_p11 }
  0x2b   :  { %v1209_v14 = vrot.slane %v848_v7, 1  ;;  %v1208_v15 = vrot.slane %v851_v8, 1  ;;  %v869_v16 = vmul.f32 %v96_v12, %v826_v0  ;;  %v872_v17 = vmul.f32 %v96_v12, %v830_v1  ;;  %s874_s17 = sld [smem:[#allocation8 + $0x1]] }
  0x2c   :  { %v1207_v18 = vrot.slane %v856_v10, 2  ;;  %v1206_v19 = vrot.slane %v859_v11, 2  ;;  %v372_v20 = vstv %s828_s12  ;;  %v207_v21 = vstv %s832_s13  ;;  %s880_s18 = sld [smem:[#allocation8 + $0x5]]  ;;  %p734_p0 = pnand %p733_p13, %p727_p10 }
  0x2d   :  { %v1205_v22 = vrot.slane %v869_v16, 3  ;;  %v1204_v23 = vrot.slane %v872_v17, 3  ;;  %v373_v24 = vadd.f32 %v372_v20, %v837_v3  ;;  %v374_v25 = vadd.f32 %v372_v20, %v845_v6  ;;  %s894_s19 = sld [smem:[#allocation8 + $0x9]] }
  0x2e   :  { %v887_v26 = vmul.f32 %v207_v21, %v826_v0  ;;  %v890_v27 = vmul.f32 %v207_v21, %v830_v1  ;;  %v215_v28 = vstv %s834_s2  ;;  %v227_v29 = vstv %s842_s14  ;;  %s906_s20 = sld [smem:[#allocation8 + $0xd]] }
  0x2f   :  { %v375_v30 = vadd.f32 %v373_v24, %v1209_v14  ;;  %v376_v31 = vadd.f32 %v374_v25, %v1208_v15  ;;  %v901_v32 = vmul.f32 %v215_v28, %v826_v0  ;;  %v904_v33 = vmul.f32 %v215_v28, %v830_v1  ;;  %s922_s21 = sld [smem:[#allocation7 + $0x5]] }
  0x30   :  { %v909_v34 = vmul.f32 %v227_v29, %v826_v0  ;;  %v912_v35 = vmul.f32 %v227_v29, %v830_v1  ;;  %v239_v36 = vstv %s853_s15  ;;  %v466_v37 = vstv %s864_s16  ;;  %s932_s22 = sld [smem:[#allocation8 + $0x3]] }
  0x31   :  { %v377_v38 = vadd.f32 %v375_v30, %v1207_v18  ;;  %v378_v39 = vadd.f32 %v376_v31, %v1206_v19  ;;  %v220_v40 = vrot.slane %v901_v32, 1  ;;  %v221_v41 = vrot.slane %v904_v33, 1  ;;  %s940_s23 = sld [smem:[#allocation8 + $0x7]] }
  0x32   :  { %v232_v42 = vrot.slane %v909_v34, 2  ;;  %v1212_v43 = vrot.slane %v912_v35, 2  ;;  %v927_v44 = vmul.f32 %v239_v36, %v826_v0  ;;  %v930_v45 = vmul.f32 %v239_v36, %v830_v1  ;;  %s946_s24 = sld [smem:[#allocation8 + $0xb]] }
  0x33   :  { %v379_v46 = vadd.f32 %v377_v38, %v1205_v22  ;;  %v380_v47 = vadd.f32 %v378_v39, %v1204_v23  ;;  %v467_v48 = vadd.f32 %v466_v37, %v887_v26  ;;  %v468_v49 = vadd.f32 %v466_v37, %v890_v27  ;;  %s955_s25 = sld [smem:[#allocation8 + $0xf]] }
  0x34   :  { %v1211_v50 = vrot.slane %v927_v44, 3  ;;  %v1210_v51 = vrot.slane %v930_v45, 3  ;;  %v125_v52 = vstv %s874_s17  ;;  %v133_v53 = vstv %s880_s18  ;;  %s980_s26 = sld [smem:[#allocation7 + $0x7]] }
  0x35   :  { %654 = vtanh.f32 %v379_v46  ;;  %v469_v54 = vadd.f32 %v467_v48, %v220_v40  ;;  %v470_v55 = vadd.f32 %v468_v49, %v221_v41  ;;  %v953_v56 = vmul.f32 %v125_v52, %v826_v0  ;;  %s992_s27 = sld [smem:[#allocation7 + $0x1]] }
  0x36   :  { %656 = vtanh.f32 %v380_v47  ;;  %v958_v57 = vmul.f32 %v125_v52, %v830_v1  ;;  %v961_v58 = vmul.f32 %v133_v53, %v826_v0  ;;  %v964_v59 = vmul.f32 %v133_v53, %v830_v1  ;;  %s998_s28 = sld [smem:[#allocation7 + $0x2]] }
  0x37   :  { %v471_v60 = vadd.f32 %v469_v54, %v232_v42  ;;  %v472_v61 = vadd.f32 %v470_v55, %v1212_v43  ;;  %v145_v62 = vstv %s894_s19  ;;  %v157_v63 = vstv %s906_s20  ;;  %s1054_s29 = sld [smem:[#allocation7 + $0x3]] }
  0x38   :  { %v138_v2 = vrot.slane %v961_v58, 1  ;;  %v139_v4 = vrot.slane %v964_v59, 1  ;;  %v975_v9 = vmul.f32 %v145_v62, %v826_v0  ;;  %v978_v12 = vmul.f32 %v145_v62, %v830_v1  ;;  %s1074_s1 = sld [smem:[#allocation7]] }
  0x39   :  { %v473_v20 = vadd.f32 %v471_v60, %v1211_v50  ;;  %v474_v21 = vadd.f32 %v472_v61, %v1210_v51  ;;  %v987_v24 = vmul.f32 %v157_v63, %v826_v0  ;;  %v990_v25 = vmul.f32 %v157_v63, %v830_v1 }
  0x3a   :  { %v150_v28 = vrot.slane %v975_v9, 2  ;;  %v151_v29 = vrot.slane %v978_v12, 2  ;;  %v417_v30 = vstv %s922_s21  ;;  %v289_v31 = vstv %s932_s22 }
  0x3b   :  { %658 = vtanh.f32 %v473_v20  ;;  %v162_v36 = vrot.slane %v987_v24, 3  ;;  %v163_v37 = vrot.slane %v990_v25, 3  ;;  %v418_v38 = vadd.f32 %v417_v30, %v953_v56 }
  0x3c   :  { %660 = vtanh.f32 %v474_v21  ;;  %v419_v39 = vadd.f32 %v417_v30, %v958_v57  ;;  %v1005_v46 = vmul.f32 %v289_v31, %v826_v0  ;;  %v1008_v47 = vmul.f32 %v289_v31, %v830_v1 }
  0x3d   :  { %v420_v48 = vadd.f32 %v418_v38, %v138_v2  ;;  %v297_v49 = vstv %s940_s23  ;;  %v309_v52 = vstv %s946_s24  ;;  %v321_v53 = vstv %s955_s25 }
  0x3e   :  { %v421_v54 = vadd.f32 %v419_v39, %v139_v4  ;;  %v1018_v55 = vmul.f32 %v297_v49, %v826_v0  ;;  %v1021_v60 = vmul.f32 %v297_v49, %v830_v1  ;;  %v1024_v61 = vmul.f32 %v309_v52, %v826_v0 }
  0x3f   :  { %v422_v62 = vadd.f32 %v420_v48, %v150_v28  ;;  %v1029_v63 = vmul.f32 %v309_v52, %v830_v1  ;;  %v1032_v20 = vmul.f32 %v321_v53, %v826_v0  ;;  %v1035_v21 = vmul.f32 %v321_v53, %v830_v1 }
  0x40   :  { %v423_v30 = vadd.f32 %v421_v54, %v151_v29  ;;  %v302_v31 = vrot.slane %v1018_v55, 1  ;;  %v303_v38 = vrot.slane %v1021_v60, 1  ;;  %v314_v39 = vrot.slane %v1024_v61, 2 }
  0x41   :  { %v424_v48 = vadd.f32 %v422_v62, %v162_v36  ;;  %v315_v49 = vrot.slane %v1029_v63, 2  ;;  %v326_v0 = vrot.slane %v1032_v20, 3  ;;  %v327_v52 = vrot.slane %v1035_v21, 3 }
  0x42   :  { %v655_v1 = vpop.eup %654  ;;  %v425_v53 = vadd.f32 %v423_v30, %v163_v37  ;;  %v515_v54 = vstv %s980_s26  ;;  %v129_v23 = vstv %s992_s27  ;;  %v211_v22 = vstv %s998_s28 }
  0x43   :  { %v657_v19 = vpop.eup %656  ;;  %v383_v18 = vmul.f32 0.23076923, %v655_v1  ;;  %662 = vtanh.f32 %v424_v48  ;;  %v516_v15 = vadd.f32 %v515_v54, %v1005_v46  ;;  %v517_v62 = vadd.f32 %v515_v54, %v1008_v47 }
  0x44   :  { %v384_v14 = vmul.f32 0.23076923, %v657_v19  ;;  %664 = vtanh.f32 %v425_v53  ;;  %v130_v51 = vadd.f32 %v129_v23, %v953_v56  ;;  %v131_v50 = vadd.f32 %v129_v23, %v958_v57 }
  0x45   :  { %v1059_v30 = vadd.f32 %v383_v18, %v840_v5  ;;  %v518_v1 = vadd.f32 %v516_v15, %v302_v31  ;;  %v519_v48 = vadd.f32 %v517_v62, %v303_v38  ;;  %v212_v54 = vadd.f32 %v211_v22, %v887_v26 }
  0x46   :  { %v1067_v43 = vadd.f32 %v384_v14, %v862_v13  ;;  %v142_v19 = vadd.f32 %v138_v2, %v130_v51  ;;  %v143_v23 = vadd.f32 %v139_v4, %v131_v50  ;;  %v213_v18 = vadd.f32 %v211_v22, %v890_v27 }
  0x47   :  { %v388_v15 = vsel %vm387_vm0, %v1059_v30, 0.0  ;;  %v520_v56 = vadd.f32 %v518_v1, %v314_v39  ;;  %v521_v14 = vadd.f32 %v519_v48, %v315_v49  ;;  %v224_v26 = vadd.f32 %v220_v40, %v212_v54 }
  0x48   :  { %v659_v51 = vpop.eup %658  ;;  %v389_v50 = vsel %vm387_vm0, %v1067_v43, 0.0  ;;  %v154_v22 = vadd.f32 %v150_v28, %v142_v19  ;;  %v155_v27 = vadd.f32 %v151_v29, %v143_v23  ;;  %v225_v57 = vadd.f32 %v221_v41, %v213_v18 }
  0x49   :  { %v661_v58 = vpop.eup %660  ;;  %v390_v59 = vadd.f32 %v389_v50, %v388_v15  ;;  %v477_v2 = vmul.f32 0.23076923, %v659_v51  ;;  %v522_v32 = vadd.f32 %v520_v56, %v326_v0  ;;  %v523_v40 = vadd.f32 %v521_v14, %v327_v52 }
  0x4a   :  { %v478_v4 = vmul.f32 0.23076923, %v661_v58  ;;  %v166_v9 = vadd.f32 %v162_v36, %v154_v22  ;;  %v167_v12 = vadd.f32 %v163_v37, %v155_v27  ;;  %v236_v33 = vadd.f32 %v232_v42, %v224_v26 }
  0x4b   :  { %391 = vadd.xlane.f32.xlu0 %v390_v59  ;;  %v481_v41 = vrot.slane %v477_v2, 6  ;;  %666 = vtanh.f32 %v522_v32  ;;  %v1213_v28 = vrot.slane %v912_v35, 2  ;;  %v293_v53 = vstv %s1054_s29 }
  0x4c   :  { %v482_v62 = vrot.slane %v478_v4, 6  ;;  %668 = vtanh.f32 %v523_v40  ;;  %v1214_v1 = vrot.slane %v927_v44, 3  ;;  %v294_v36 = vadd.f32 %v293_v53, %v1005_v46 }
  0x4d   :  { %v237_v29 = vadd.f32 %v1213_v28, %v225_v57  ;;  %v1109_v25 = vadd.f32 %v481_v41, %v840_v5  ;;  %670 = vtanh.f32 %v166_v9  ;;  %v1215_v34 = vrot.slane %v930_v45, 3 }
  0x4e   :  { %v248_v24 = vadd.f32 %v1214_v1, %v236_v33  ;;  %v295_v37 = vadd.f32 %v293_v53, %v1008_v47  ;;  %v1115_v35 = vadd.f32 %v482_v62, %v862_v13  ;;  %672 = vtanh.f32 %v167_v12 }
  0x4f   :  { %v249_v42 = vadd.f32 %v1215_v34, %v237_v29  ;;  %v306_v48 = vadd.f32 %v302_v31, %v294_v36  ;;  %v68_v44 = vstv %s1074_s1  ;;  %v488_v46 = vsel %vm487_vm1, %v1109_v25, 0.0 }
  0x50   :  { %674 = vtanh.f32 %v248_v24  ;;  %v307_v54 = vadd.f32 %v303_v38, %v295_v37  ;;  %v69_v45 = vadd.f32 %v68_v44, %v837_v3  ;;  %v663_v19 = vpop.eup %662  ;;  %v489_v47 = vsel %vm487_vm1, %v1115_v35, 0.0 }
  0x51   :  { %676 = vtanh.f32 %v249_v42  ;;  %v318_v23 = vadd.f32 %v314_v39, %v306_v48  ;;  %v70_v55 = vadd.f32 %v68_v44, %v845_v6  ;;  %v665_v31 = vpop.eup %664  ;;  %v490_v18 = vadd.f32 %v489_v47, %v488_v46 }
  0x52   :  { %v428_v15 = vmul.f32 0.23076923, %v663_v19  ;;  %v319_v56 = vadd.f32 %v315_v49, %v307_v54  ;;  %v1216_v60 = vrot.slane %v848_v7, 1  ;;  %v429_v3 = vmul.f32 0.23076923, %v665_v31 }
  0x53   :  { %v330_v14 = vadd.f32 %v326_v0, %v318_v23  ;;  %v1217_v26 = vrot.slane %v851_v8, 1  ;;  %491 = vadd.xlane.f32.xlu1 %v490_v18  ;;  %v1218_v39 = vrot.slane %v856_v10, 2  ;;  %v1219_v7 = vrot.slane %v859_v11, 2 }
  0x54   :  { %v81_v38 = vadd.f32 %v1216_v60, %v69_v45  ;;  %v432_v61 = vrot.slane %v428_v15, 7  ;;  %v331_v6 = vadd.f32 %v327_v52, %v319_v56  ;;  %v433_v63 = vrot.slane %v429_v3, 7 }
  0x55   :  { %v82_v51 = vadd.f32 %v1217_v26, %v70_v55  ;;  %678 = vtanh.f32 %v330_v14  ;;  %v1220_v8 = vrot.slane %v869_v16, 3  ;;  %v1221_v21 = vrot.slane %v872_v17, 3 }
  0x56   :  { %v93_v50 = vadd.f32 %v1218_v39, %v81_v38  ;;  %v1145_v20 = vadd.f32 %v432_v61, %v840_v5  ;;  %680 = vtanh.f32 %v331_v6  ;;  %v1150_v22 = vadd.f32 %v433_v63, %v862_v13 }
  0x57   :  { %v94_v49 = vadd.f32 %v1219_v7, %v82_v51 }
  0x58   :  { %v105_v0 = vadd.f32 %v1220_v8, %v93_v50  ;;  %v439_v52 = vsel %vm438_vm2, %v1145_v20, 0.0  ;;  %v667_v27 = vpop.eup %666  ;;  %v440_v11 = vsel %vm438_vm2, %v1150_v22, 0.0 }
  0x59   :  { %v106_v10 = vadd.f32 %v1221_v21, %v94_v49  ;;  %v669_v57 = vpop.eup %668  ;;  %v441_v58 = vadd.f32 %v440_v11, %v439_v52  ;;  %v526_v59 = vmul.f32 0.23076923, %v667_v27 }
  0x5a   :  { %682 = vtanh.f32 %v105_v0  ;;  %v671_v2 = vpop.eup %670  ;;  %v527_v32 = vmul.f32 0.23076923, %v669_v57 }
  0x5b   :  { %684 = vtanh.f32 %v106_v10  ;;  %v673_v16 = vpop.eup %672  ;;  %442 = vadd.xlane.f32.xlu0 %v441_v58  ;;  %v530_v40 = vrot.slane %v526_v59, 5  ;;  %v170_v4 = vmul.f32 0.23076923, %v671_v2 }
  0x5c   :  { %v531_v12 = vrot.slane %v527_v32, 5  ;;  %v171_v17 = vmul.f32 0.23076923, %v673_v16 }
  0x5d   :  { %v675_v9 = vpop.eup %674  ;;  %v1157_v41 = vadd.f32 %v530_v40, %v840_v5  ;;  %v174_v28 = vrot.slane %v170_v4, 7 }
  0x5e   :  { %v677_v33 = vpop.eup %676  ;;  %v252_v29 = vmul.f32 0.23076923, %v675_v9  ;;  %v1160_v53 = vadd.f32 %v531_v12, %v862_v13  ;;  %v175_v62 = vrot.slane %v171_v17, 7 }
  0x5f   :  { %v253_v1 = vmul.f32 0.23076923, %v677_v33  ;;  %v537_v24 = vsel %vm536_vm3, %v1157_v41, 0.0  ;;  %v178_v36 = vadd.f32 %v174_v28, %v840_v5 }
  0x60   :  { %v256_v34 = vrot.slane %v252_v29, 6  ;;  %v538_v42 = vsel %vm536_vm3, %v1160_v53, 0.0  ;;  %v179_v37 = vadd.f32 %v175_v62, %v862_v13 }
  0x61   :  { %v257_v48 = vrot.slane %v253_v1, 6  ;;  %v539_v46 = vadd.f32 %v538_v42, %v537_v24  ;;  %v181_v54 = vsel %vm180_vm4, %v178_v36, 0.0 }
  0x62   :  { %v679_v44 = vpop.eup %678  ;;  %v260_v45 = vadd.f32 %v256_v34, %v840_v5  ;;  %v182_v47 = vsel %vm180_vm4, %v179_v37, 0.0 }
  0x63   :  { %v681_v19 = vpop.eup %680  ;;  %v261_v23 = vadd.f32 %v257_v48, %v862_v13  ;;  %v334_v55 = vmul.f32 0.23076923, %v679_v44  ;;  %540 = vadd.xlane.f32.xlu1 %v539_v46  ;;  %v183_v31 = vadd.f32 %v182_v47, %v181_v54 }
  0x64   :  { %v263_v18 = vsel %vm262_vm5, %v260_v45, 0.0  ;;  %v335_v15 = vmul.f32 0.23076923, %v681_v19 }
  0x65   :  { %v264_v60 = vsel %vm262_vm5, %v261_v23, 0.0  ;;  %v338_v38 = vrot.slane %v334_v55, 5  ;;  %184 = vadd.xlane.f32.xlu0 %v183_v31 }
  0x66   :  { %v265_v14 = vadd.f32 %v264_v60, %v263_v18  ;;  %v339_v26 = vrot.slane %v335_v15, 5 }
  0x67   :  { %v683_v56 = vpop.eup %682  ;;  %v342_v61 = vadd.f32 %v338_v38, %v840_v5 }
  0x68   :  { %v685_v3 = vpop.eup %684  ;;  %v111_v51 = vmul.f32 0.23076923, %v683_v56  ;;  %266 = vadd.xlane.f32.xlu1 %v265_v14  ;;  %v343_v39 = vadd.f32 %v339_v26, %v862_v13 }
  0x69   :  { %v112_v6 = vmul.f32 0.23076923, %v685_v3  ;;  %v345_v63 = vsel %vm344_vm6, %v342_v61, 0.0 }
  0x6a   :  { %v113_v50 = vadd.f32 %v111_v51, %v840_v5  ;;  %v346_v49 = vsel %vm344_vm6, %v343_v39, 0.0 }
  0x6b   :  { %v114_v7 = vadd.f32 %v112_v6, %v862_v13  ;;  %v347_v0 = vadd.f32 %v346_v49, %v345_v63 }
  0x6c   :  { %v116_v8 = vsel %vm115_vm7, %v113_v50, 0.0  ;;  %v564_v52 = vsel %vm115_vm7, %v113_v50, %v178_v36 }
  0x6d   :  { %v117_v21 = vsel %vm115_vm7, %v114_v7, 0.0  ;;  %348 = vadd.xlane.f32.xlu0 %v347_v0  ;;  %v565_v27 = vsel %vm115_vm7, %v114_v7, %v179_v37  ;;  %v567_v11 = vsel %vm566_vm8, %v564_v52, %v260_v45 }
  0x6e   :  { %v118_v10 = vadd.f32 %v117_v21, %v116_v8  ;;  %v568_v57 = vsel %vm566_vm8, %v565_v27, %v261_v23  ;;  %v570_v5 = vsel %vm569_vm9, %v567_v11, %v342_v61 }
  0x6f   :  { %v571_v58 = vsel %vm569_vm9, %v568_v57, %v343_v39  ;;  %v573_v13 = vsel %vm572_vm10, %v570_v5, %v1059_v30 }
  0x70   :  { %119 = vadd.xlane.f32.xlu1 %v118_v10  ;;  %v574_v59 = vsel %vm572_vm10, %v571_v58, %v1067_v43  ;;  %v576_v2 = vsel %vm575_vm11, %v573_v13, %v1145_v20 }
  0x71   :  { %v577_v32 = vsel %vm575_vm11, %v574_v59, %v1150_v22  ;;  %v579_v16 = vsel %vm578_vm12, %v576_v2, %v1109_v25 }
  0x72   :  { %v580_v40 = vsel %vm578_vm12, %v577_v32, %v1115_v35  ;;  %v582_v4 = vsel %vm581_vm13, %v579_v16, %v1157_v41 }
  0x73   :  { %v583_v9 = vsel %vm581_vm13, %v580_v40, %v1160_v53  ;;  %584 = vst [vmem:[#allocation10] sm:$0xff] %v582_v4 }
  0x74   :  { %585 = vst [vmem:[#allocation10 + $0x8] sm:$0xff] %v583_v9 }
  0x75   :  { %737 = shalt.err (!%p734_p0)
}
  0x76   :  { %614 = dma.vmem_to_hbm [thread:$0]  %s612_s7, 256, %s1203_s6, [#allocation11]   ;;  %v61_v43 = vld [vmem:[%s1200_s3] sm:$0xf]  ;;  %v780_v25 = vmov 1966171168   ;;  %v192_v20 = vlaneseq }
  0x77   :  { %v190_v35 = vunpack.c.l.s4 %v780_v25  ;;  %v395_v22 = vrot.slane %v61_v43, 4  ;;  %v62_v38 = vld [vmem:[%s1201_s4] sm:$0x1]  ;;  %s781_s4 = smov [#allocation9]   ;;  %vm593_vm14 = vcmask 58368  }
  0x78   :  { %v193_v41 = vshrl.u32 %v192_v20, 7  ;;  %s601_s12 = sshll.u32 %s781_s4, 4  ;;  %s602_s12 = int_to_ptr.vmem [resolvable:$true] %s601_s12 }
  0x79   :  { %v191_v33 = vunpack.c.0.s8 %v190_v35  ;;  %s746_s13 = scalar_lea.vmem %s602_s12, 32  ;;  %p751_p2 = scmp.lt.s32.totalorder %s602_s12, %s602_s12 }
  0x7a   :  { %p747_p1 = scmp.ne.s32.totalorder %s602_s12, %s746_s13  ;;  %p752_p3 = scmp.lt.s32.totalorder %s746_s13, %s746_s13 }
  0x7b   :  { %v194_v24 = vsub.s32 %v191_v33, %v193_v41 }
  0x7c   :  { %p753_p4 = por %p752_p3, %p751_p2 }
  0x7e   :  { %p754_p5 = pnand %p753_p4, %p747_p1 }
  0xd4   :  { %v392_v30 = vpop.xlane.xlu0 %391 }
  0xd5   :  { %v393_v12 = vmul.f32 0.00390625, %v392_v30  ;;  %v589_v30 = vsub.s32 0, %v193_v41 }
  0xd7   :  { %v397_v28 = vmul.f32 %v395_v22, %v393_v12 }
  0xd9   :  { %v399_v36 = vcombine.high %v397_v28, %v397_v28 }
  0xdb   :  { %v406_v48 = vrot.slane %v399_v36, %v194_v24 }
  0xdc   :  { %v492_v17 = vpop.xlane.xlu1 %491 }
  0xdd   :  { %v493_v29 = vmul.f32 0.00390625, %v492_v17  ;;  %v413_v55 = vrot.slane %v406_v48, %v194_v24 }
  0xdf   :  { %v494_v34 = vmul.f32 %v493_v29, %v395_v22  ;;  %v415_v6 = vadd.f32 %v413_v55, %v62_v38 }
  0xe1   :  { %v496_v44 = vcombine.high %v494_v34, %v494_v34 }
  0xe3   :  { %v503_v31 = vrot.slane %v496_v44, %v194_v24 }
  0xe4   :  { %v443_v53 = vpop.xlane.xlu0 %442 }
  0xe5   :  { %v444_v62 = vmul.f32 0.00390625, %v443_v53  ;;  %v510_v61 = vrot.slane %v503_v31, %v194_v24 }
  0xe7   :  { %v445_v1 = vmul.f32 %v444_v62, %v395_v22  ;;  %v511_v52 = vcombine.high %v510_v61, %v510_v61 }
  0xe9   :  { %v447_v42 = vcombine.high %v445_v1, %v445_v1 }
  0xeb   :  { %v454_v37 = vrot.slane %v447_v42, %v194_v24 }
  0xec   :  { %v541_v46 = vpop.xlane.xlu1 %540 }
  0xed   :  { %v542_v54 = vmul.f32 0.00390625, %v541_v46  ;;  %v455_v45 = vcombine.high %v454_v37, %v454_v37 }
  0xee   :  { %v185_v19 = vpop.xlane.xlu0 %184 }
  0xef   :  { %v543_v47 = vmul.f32 %v542_v54, %v395_v22  ;;  %v186_v23 = vmul.f32 0.00390625, %v185_v19  ;;  %v462_v3 = vrot.slane %v455_v45, %v194_v24 }
  0xf1   :  { %v267_v18 = vpop.xlane.xlu1 %266  ;;  %v545_v15 = vcombine.high %v543_v47, %v543_v47  ;;  %v187_v56 = vmul.f32 %v186_v23, %v61_v43  ;;  %v464_v49 = vadd.f32 %v462_v3, %v415_v6 }
  0xf2   :  { %v268_v60 = vmul.f32 0.00390625, %v267_v18 }
  0xf3   :  { %v552_v14 = vrot.slane %v545_v15, %v194_v24  ;;  %v195_v26 = vrot.slane %v187_v56, %v194_v24  ;;  %v513_v13 = vadd.f32 %v511_v52, %v464_v49 }
  0xf4   :  { %v269_v51 = vmul.f32 %v268_v60, %v61_v43 }
  0xf5   :  { %v553_v39 = vcombine.high %v552_v14, %v552_v14  ;;  %v196_v21 = vcombine.high %v195_v26, %v195_v26 }
  0xf6   :  { %v277_v50 = vrot.slane %v269_v51, %v194_v24  ;;  %v349_v63 = vpop.xlane.xlu0 %348 }
  0xf7   :  { %v350_v7 = vmul.f32 0.00390625, %v349_v63  ;;  %v560_v0 = vrot.slane %v553_v39, %v194_v24  ;;  %v203_v59 = vrot.slane %v196_v21, %v194_v24 }
  0xf8   :  { %v284_v11 = vrot.slane %v277_v50, %v194_v24 }
  0xf9   :  { %v120_v8 = vpop.xlane.xlu1 %119  ;;  %v351_v27 = vmul.f32 %v350_v7, %v61_v43  ;;  %v561_v5 = vcombine.high %v560_v0, %v560_v0 }
  0xfa   :  { %v121_v10 = vmul.f32 0.00390625, %v120_v8  ;;  %v285_v16 = vcombine.high %v284_v11, %v284_v11 }
  0xfb   :  { %v359_v58 = vrot.slane %v351_v27, %v194_v24  ;;  %v563_v9 = vadd.f32 %v561_v5, %v513_v13 }
  0xfc   :  { %v122_v57 = vmul.f32 %v121_v10, %v61_v43 }
  0xfd   :  { %v360_v32 = vcombine.high %v359_v58, %v359_v58  ;;  %v590_v22 = vrot.slane %v563_v9, %v589_v30 }
  0xfe   :  { %v123_v2 = vadd.f32 %v122_v57, %v62_v38 }
  0xff   :  { %v367_v4 = vrot.slane %v360_v32, %v194_v24 }
 0x100   :  { %v205_v40 = vadd.f32 %v203_v59, %v123_v2 }
 0x101   :  { %v368_v35 = vcombine.high %v367_v4, %v367_v4 }
 0x102   :  { %v287_v25 = vadd.f32 %v285_v16, %v205_v40 }
 0x104   :  { %v370_v20 = vadd.f32 %v368_v35, %v287_v25 }
 0x106   :  { %v592_v43 = vsel %vm115_vm7, %v370_v20, %v590_v22 }
 0x107   :  { %594 = vst.msk [vmem:[#allocation9] sm:$0x3] %vm593_vm14, %v592_v43 }
 0x108   :  { %757 = shalt.err (!%p754_p5)
}
 0x109   :  { %604 = dma.vmem_to_hbm [thread:$0]  %s602_s12, 32, %s1202_s5, [#allocation4]  }
 0x10a   :  { %772 = dma.done.wait [#allocation4], 32  }
 0x10b   :  { %773 = vsyncadd [#allocation4], 4294967264 }
 0x10c   :  { %774 = dma.done.wait [#allocation11], 256  }
 0x10d   :  { %775 = vsyncadd [#allocation11], 4294967040 }
 0x10e   :  { %621 = vsyncpa [#allocation3], 1 }
 0x10f   :  { %622 = vsyncpa [#allocation4], 1 }
 0x110   :  { %623 = vsyncpa [#allocation11], 1 }
 0x111   :  { %624 = vsyncpa [#allocation5], 1 }
 0x112   :  { %625 = vsyncpa [#allocation6], 1 }

</bundles_post_ra>
